<compile_context>
chip_gen: v7x
topology: tpu7x:2x2x1
jax: 0.10.0
libtpu: 0.0.40
codegen_flags: <defaults>
</compile_context>

<pallas_src>
import functools

import jax
import jax.numpy as jnp
from jax.experimental import pallas as pl
from jax.experimental.pallas import tpu as pltpu


def _mlp_kernel(x_ref, c_ref, w1x_ref, w1c_ref, b1_ref, w2_ref, b2_ref,
                w3_ref, b3_ref, o_ref):
    wdt = w1x_ref.dtype  # compute dots in weight dtype, accumulate in f32
    # Layer 1: (x @ W1x + c @ W1c) + b1, ReLU  -- concat-free.
    h1 = jnp.dot(x_ref[...].astype(wdt), w1x_ref[...],
                 preferred_element_type=jnp.float32)
    h1 = h1 + jnp.dot(c_ref[...].astype(wdt), w1c_ref[...],
                      preferred_element_type=jnp.float32)
    h1 = jnp.maximum(h1 + b1_ref[...], 0.0)
    # Layer 2: Linear + ReLU.
    h2 = jnp.dot(h1.astype(wdt), w2_ref[...],
                 preferred_element_type=jnp.float32)
    h2 = jnp.maximum(h2 + b2_ref[...], 0.0)
    # Layer 3: Linear.
    y = jnp.dot(h2.astype(wdt), w3_ref[...],
                preferred_element_type=jnp.float32) + b3_ref[...]
    # torch.clamp(y, 0.0, 100.0)
    o_ref[...] = jnp.clip(y, 0.0, 100.0).astype(o_ref.dtype)


@functools.partial(jax.jit, static_argnames=("max_tb",))
def nn_forward(x, c, params, *, max_tb=512):
    """Pallas implementation of NN.forward(x, c).

    params = (w1x, w1c, b1, w2, b2, w3, b3); weights stored transposed vs
    PyTorch, i.e. shape (fan_in, fan_out), biases shaped (1, fan_out).
    """
    w1x, w1c, b1, w2, b2, w3, b3 = params
    B, DX = x.shape
    DC = c.shape[1]
    H1, H2, OUT = w1x.shape[1], w2.shape[1], w3.shape[1]

    # Batch tile: multiple of 8 sublanes, large enough to amortize per-step
    # grid overhead, capped so tiny batches don't pad excessively.
    TB = min(max_tb, max(8, ((B + 7) // 8) * 8))
    n_blocks = pl.cdiv(B, TB)
    Bp = n_blocks * TB
    if Bp != B:  # pad batch rows so the grid divides evenly (no-op for aligned B)
        x = jnp.pad(x, ((0, Bp - B), (0, 0)))
        c = jnp.pad(c, ((0, Bp - B), (0, 0)))

    batch_map = lambda i: (i, 0)
    const_map = lambda i: (0, 0)

    in_specs = [
        pl.BlockSpec((TB, DX), batch_map),      # x: streamed per batch tile
        pl.BlockSpec((TB, DC), batch_map),      # c: streamed per batch tile
        pl.BlockSpec((DX, H1), const_map),      # weights/biases: VMEM-resident
        pl.BlockSpec((DC, H1), const_map),
        pl.BlockSpec((1, H1), const_map),
        pl.BlockSpec((H1, H2), const_map),
        pl.BlockSpec((1, H2), const_map),
        pl.BlockSpec((H2, OUT), const_map),
        pl.BlockSpec((1, OUT), const_map),
    ]
    out_specs = pl.BlockSpec((TB, OUT), batch_map)

    flops = 2 * Bp * (DX * H1 + DC * H1 + H1 * H2 + H2 * OUT)
    bytes_accessed = (
        Bp * (DX + DC) * x.dtype.itemsize
        + Bp * OUT * 4
        + sum(int(p.size) * p.dtype.itemsize for p in params)
    )
    cost = pl.CostEstimate(flops=flops, transcendentals=0,
                           bytes_accessed=bytes_accessed)

    y = pl.pallas_call(
        _mlp_kernel,
        out_shape=jax.ShapeDtypeStruct((Bp, OUT), jnp.float32),
        grid=(n_blocks,),
        in_specs=in_specs,
        out_specs=out_specs,
        compiler_params=pltpu.CompilerParams(
            dimension_semantics=("parallel",)),  # megacore-shard batch on v7x
        cost_estimate=cost,
    )(x, c, w1x, w1c, b1, w2, b2, w3, b3)
    return y[:B]


def init_params(key, dx, dc, out_dim_class, param_dtype=jnp.float32):
    """Deterministic init matching nn.Linear shapes (stored transposed).

    W1 is split into (w1x, w1c) so the kernel never needs cat([x, c], dim=1).
    Use param_dtype=jnp.bfloat16 on v6e/v7x to halve weight HBM traffic.
    """
    in_dim = dx + dc
    h1 = in_dim // 2
    h2 = in_dim // 4
    ks = jax.random.split(key, 6)

    def lin(kw, kb, fan_in, fan_out):
        bound = 1.0 / jnp.sqrt(fan_in)
        w = jax.random.uniform(kw, (fan_in, fan_out), jnp.float32, -bound, bound)
        b = jax.random.uniform(kb, (1, fan_out), jnp.float32, -bound, bound)
        return w.astype(param_dtype), b  # biases stay f32 (f32 elementwise path)

    w1, b1 = lin(ks[0], ks[1], in_dim, h1)
    w2, b2 = lin(ks[2], ks[3], h1, h2)
    w3, b3 = lin(ks[4], ks[5], h2, out_dim_class)
    w1x, w1c = w1[:dx], w1[dx:]
    return (w1x, w1c, b1, w2, b2, w3, b3)


if __name__ == "__main__":
    key = jax.random.PRNGKey(0)
    kx, kc, kp = jax.random.split(key, 3)

    # Small shapes: x has 24 features, c (condition) has 8 -> in_dim = 32.
    B, DX, DC, OUT = 2, 24, 8, 4

    x = jax.random.normal(kx, (B, DX), dtype=jnp.float32)
    c = jax.random.normal(kc, (B, DC), dtype=jnp.float32)
    params = init_params(kp, DX, DC, OUT)  # f32 demo so atol=1e-5 holds

    y = nn_forward(x, c, params)
    jax.block_until_ready(y)

    # Reference check in plain JAX (reconstruct the concatenated-W1 math).
    w1x, w1c, b1, w2, b2, w3, b3 = params
    w1 = jnp.concatenate([w1x, w1c], axis=0).astype(jnp.float32)
    xc = jnp.concatenate([x, c], axis=1)
    r = jnp.maximum(xc @ w1 + b1, 0.0)
    r = jnp.maximum(r @ w2.astype(jnp.float32) + b2, 0.0)
    r = jnp.clip(r @ w3.astype(jnp.float32) + b3, 0.0, 100.0)
    assert y.shape == (B, OUT)
    assert jnp.allclose(y, r, atol=1e-5), "mismatch vs reference"

    print("KERNEL_OK")
</pallas_src>

<mosaic_0001>
module attributes {stable_mosaic.version = 11 : i64} {
  func.func @_mlp_kernel(%arg0: i32, %arg1: memref<8x24xf32, #tpu.memory_space<vmem>>, %arg2: memref<8x8xf32, #tpu.memory_space<vmem>>, %arg3: memref<24x16xf32, #tpu.memory_space<vmem>>, %arg4: memref<8x16xf32, #tpu.memory_space<vmem>>, %arg5: memref<1x16xf32, #tpu.memory_space<vmem>>, %arg6: memref<16x8xf32, #tpu.memory_space<vmem>>, %arg7: memref<1x8xf32, #tpu.memory_space<vmem>>, %arg8: memref<8x4xf32, #tpu.memory_space<vmem>>, %arg9: memref<1x4xf32, #tpu.memory_space<vmem>>, %arg10: memref<8x4xf32, #tpu.memory_space<vmem>>) attributes {dimension_semantics = [#tpu.dimension_semantics<parallel>], iteration_bounds = array<i64: 1>, scalar_prefetch = 0 : i64, scratch_operands = 0 : i64, tpu.core_type = #tpu.core_type<tc>, window_params = [{transform_indices = @transform_0, window_bounds = array<i64: 8, 24>}, {transform_indices = @transform_1, window_bounds = array<i64: 8, 8>}, {pipeline_mode = #tpu.pipeline_mode<synchronous>, transform_indices = @transform_2, window_bounds = array<i64: 24, 16>}, {pipeline_mode = #tpu.pipeline_mode<synchronous>, transform_indices = @transform_3, window_bounds = array<i64: 8, 16>}, {pipeline_mode = #tpu.pipeline_mode<synchronous>, transform_indices = @transform_4, window_bounds = array<i64: 1, 16>}, {pipeline_mode = #tpu.pipeline_mode<synchronous>, transform_indices = @transform_5, window_bounds = array<i64: 16, 8>}, {pipeline_mode = #tpu.pipeline_mode<synchronous>, transform_indices = @transform_6, window_bounds = array<i64: 1, 8>}, {pipeline_mode = #tpu.pipeline_mode<synchronous>, transform_indices = @transform_7, window_bounds = array<i64: 8, 4>}, {pipeline_mode = #tpu.pipeline_mode<synchronous>, transform_indices = @transform_8, window_bounds = array<i64: 1, 4>}, {transform_indices = @transform_9, window_bounds = array<i64: 8, 4>}]} {
    %c0 = arith.constant 0 : index
    %c0_0 = arith.constant 0 : index
    %0 = vector.load %arg1[%c0, %c0_0] : memref<8x24xf32, #tpu.memory_space<vmem>>, vector<8x24xf32>
    %c0_1 = arith.constant 0 : index
    %c0_2 = arith.constant 0 : index
    %1 = vector.load %arg3[%c0_1, %c0_2] : memref<24x16xf32, #tpu.memory_space<vmem>>, vector<24x16xf32>
    %cst = arith.constant dense<0.000000e+00> : vector<8x16xf32>
    %2 = tpu.matmul %0, %1, %cst {dimension_numbers = #tpu.dot_dimension_numbers<[1], [0], [0], [1], [0, 0, 1, 1], [], []>} : vector<8x24xf32>, vector<24x16xf32>, vector<8x16xf32> -> vector<8x16xf32>
    %c0_3 = arith.constant 0 : index
    %c0_4 = arith.constant 0 : index
    %3 = vector.load %arg2[%c0_3, %c0_4] : memref<8x8xf32, #tpu.memory_space<vmem>>, vector<8x8xf32>
    %c0_5 = arith.constant 0 : index
    %c0_6 = arith.constant 0 : index
    %4 = vector.load %arg4[%c0_5, %c0_6] : memref<8x16xf32, #tpu.memory_space<vmem>>, vector<8x16xf32>
    %cst_7 = arith.constant dense<0.000000e+00> : vector<8x16xf32>
    %5 = tpu.matmul %3, %4, %cst_7 {dimension_numbers = #tpu.dot_dimension_numbers<[1], [0], [0], [1], [0, 0, 1, 1], [], []>} : vector<8x8xf32>, vector<8x16xf32>, vector<8x16xf32> -> vector<8x16xf32>
    %6 = arith.addf %2, %5 : vector<8x16xf32>
    %c0_8 = arith.constant 0 : index
    %c0_9 = arith.constant 0 : index
    %7 = vector.load %arg5[%c0_8, %c0_9] : memref<1x16xf32, #tpu.memory_space<vmem>>, vector<1x16xf32>
    %8 = vector.broadcast %7 : vector<1x16xf32> to vector<8x16xf32>
    %9 = arith.addf %6, %8 : vector<8x16xf32>
    %cst_10 = arith.constant 0.000000e+00 : f32
    %10 = vector.broadcast %cst_10 : f32 to vector<8x16xf32>
    %11 = arith.maximumf %9, %10 : vector<8x16xf32>
    %c0_11 = arith.constant 0 : index
    %c0_12 = arith.constant 0 : index
    %12 = vector.load %arg6[%c0_11, %c0_12] : memref<16x8xf32, #tpu.memory_space<vmem>>, vector<16x8xf32>
    %cst_13 = arith.constant dense<0.000000e+00> : vector<8x8xf32>
    %13 = tpu.matmul %11, %12, %cst_13 {dimension_numbers = #tpu.dot_dimension_numbers<[1], [0], [0], [1], [0, 0, 1, 1], [], []>} : vector<8x16xf32>, vector<16x8xf32>, vector<8x8xf32> -> vector<8x8xf32>
    %c0_14 = arith.constant 0 : index
    %c0_15 = arith.constant 0 : index
    %14 = vector.load %arg7[%c0_14, %c0_15] : memref<1x8xf32, #tpu.memory_space<vmem>>, vector<1x8xf32>
    %15 = vector.broadcast %14 : vector<1x8xf32> to vector<8x8xf32>
    %16 = arith.addf %13, %15 : vector<8x8xf32>
    %cst_16 = arith.constant 0.000000e+00 : f32
    %17 = vector.broadcast %cst_16 : f32 to vector<8x8xf32>
    %18 = arith.maximumf %16, %17 : vector<8x8xf32>
    %c0_17 = arith.constant 0 : index
    %c0_18 = arith.constant 0 : index
    %19 = vector.load %arg8[%c0_17, %c0_18] : memref<8x4xf32, #tpu.memory_space<vmem>>, vector<8x4xf32>
    %cst_19 = arith.constant dense<0.000000e+00> : vector<8x4xf32>
    %20 = tpu.matmul %18, %19, %cst_19 {dimension_numbers = #tpu.dot_dimension_numbers<[1], [0], [0], [1], [0, 0, 1, 1], [], []>} : vector<8x8xf32>, vector<8x4xf32>, vector<8x4xf32> -> vector<8x4xf32>
    %c0_20 = arith.constant 0 : index
    %c0_21 = arith.constant 0 : index
    %21 = vector.load %arg9[%c0_20, %c0_21] : memref<1x4xf32, #tpu.memory_space<vmem>>, vector<1x4xf32>
    %22 = vector.broadcast %21 : vector<1x4xf32> to vector<8x4xf32>
    %23 = arith.addf %20, %22 : vector<8x4xf32>
    %cst_22 = arith.constant 0.000000e+00 : f32
    %cst_23 = arith.constant 1.000000e+02 : f32
    %24 = vector.broadcast %cst_22 : f32 to vector<8x4xf32>
    %25 = arith.maximumf %24, %23 : vector<8x4xf32>
    %26 = vector.broadcast %cst_23 : f32 to vector<8x4xf32>
    %27 = arith.minimumf %26, %25 : vector<8x4xf32>
    %c0_24 = arith.constant 0 : index
    %c0_25 = arith.constant 0 : index
    %28 = vector.load %arg10[%c0_24, %c0_25] : memref<8x4xf32, #tpu.memory_space<vmem>>, vector<8x4xf32>
    tpu.vector_store %arg10[%c0_24, %c0_25], %27 {strides = array<i32>} : memref<8x4xf32, #tpu.memory_space<vmem>>, vector<8x4xf32>,
    return
  }
  func.func @transform_0(%arg0: i32) -> (i32, i32) {
    %c0_i32 = arith.constant 0 : i32
    %c0_i32_0 = arith.constant 0 : i32
    return %arg0, %c0_i32 : i32, i32
  }
  func.func @transform_1(%arg0: i32) -> (i32, i32) {
    %c0_i32 = arith.constant 0 : i32
    %c0_i32_0 = arith.constant 0 : i32
    return %arg0, %c0_i32 : i32, i32
  }
  func.func @transform_2(%arg0: i32) -> (i32, i32) {
    %c0_i32 = arith.constant 0 : i32
    %c0_i32_0 = arith.constant 0 : i32
    %c0_i32_1 = arith.constant 0 : i32
    return %c0_i32, %c0_i32_0 : i32, i32
  }
  func.func @transform_3(%arg0: i32) -> (i32, i32) {
    %c0_i32 = arith.constant 0 : i32
    %c0_i32_0 = arith.constant 0 : i32
    %c0_i32_1 = arith.constant 0 : i32
    return %c0_i32, %c0_i32_0 : i32, i32
  }
  func.func @transform_4(%arg0: i32) -> (i32, i32) {
    %c0_i32 = arith.constant 0 : i32
    %c0_i32_0 = arith.constant 0 : i32
    %c0_i32_1 = arith.constant 0 : i32
    return %c0_i32, %c0_i32_0 : i32, i32
  }
  func.func @transform_5(%arg0: i32) -> (i32, i32) {
    %c0_i32 = arith.constant 0 : i32
    %c0_i32_0 = arith.constant 0 : i32
    %c0_i32_1 = arith.constant 0 : i32
    return %c0_i32, %c0_i32_0 : i32, i32
  }
  func.func @transform_6(%arg0: i32) -> (i32, i32) {
    %c0_i32 = arith.constant 0 : i32
    %c0_i32_0 = arith.constant 0 : i32
    %c0_i32_1 = arith.constant 0 : i32
    return %c0_i32, %c0_i32_0 : i32, i32
  }
  func.func @transform_7(%arg0: i32) -> (i32, i32) {
    %c0_i32 = arith.constant 0 : i32
    %c0_i32_0 = arith.constant 0 : i32
    %c0_i32_1 = arith.constant 0 : i32
    return %c0_i32, %c0_i32_0 : i32, i32
  }
  func.func @transform_8(%arg0: i32) -> (i32, i32) {
    %c0_i32 = arith.constant 0 : i32
    %c0_i32_0 = arith.constant 0 : i32
    %c0_i32_1 = arith.constant 0 : i32
    return %c0_i32, %c0_i32_0 : i32, i32
  }
  func.func @transform_9(%arg0: i32) -> (i32, i32) {
    %c0_i32 = arith.constant 0 : i32
    %c0_i32_0 = arith.constant 0 : i32
    return %arg0, %c0_i32 : i32, i32
  }
}

</mosaic_0001>

<bundles_post_ra>
// kernel: nn_forward.1
= control target key start
LH: loop header
LB: loop body
LE: loop exit
PB: predicated region body
PF: predicated region fallthrough
CT: control target
= control target key end

     0   :  { %vm38_vm0 = vcmask 64512   ;;  %v421_v0 = vmov 0.0   ;;  %vm422_vm1 = vmmov 0   ;;  %v423_v5 = vmov 0.0|0.0   ;;  %s519_s3 = inlined_call_operand.vmem [shape: f32[8,16], index: 3, kind: input, shape index: {}]   ;;  %s520_s1 = inlined_call_operand.vmem [shape: f32[8,8], index: 1, kind: input, shape index: {}]   ;;  %s521_s2 = inlined_call_operand.vmem [shape: f32[24,16], index: 2, kind: input, shape index: {}]   ;;  %s522_s0 = inlined_call_operand.vmem [shape: f32[8,24], index: 0, kind: input, shape index: {}]   ;;  %s523_s5 = inlined_call_operand.vmem [shape: f32[16,8], index: 5, kind: input, shape index: {}]   ;;  %s524_s4 = inlined_call_operand.vmem [shape: f32[1,16], index: 4, kind: input, shape index: {}]   ;;  %s525_s7 = inlined_call_operand.vmem [shape: f32[8,4], index: 7, kind: input, shape index: {}]   ;;  %s526_s6 = inlined_call_operand.vmem [shape: f32[1,8], index: 6, kind: input, shape index: {}]   ;;  %s527_s8 = inlined_call_operand.vmem [shape: f32[1,4], index: 8, kind: input, shape index: {}]   ;;  %s528_s9 = inlined_call_operand.vmem [shape: f32[8,4], index: 9, kind: output, shape index: {}]  }
   0x1   :  { %386 = vmatprep.subr.mxu1 %v421_v0  ;;  %v37_v1 = vld [vmem:[%s519_s3] sm:$0xff]  ;;  %388 = vmatprep.mubr.msk.f32.mxu1 %vm422_vm1, %v421_v0  ;;  %v34_v4 = vld [vmem:[%s521_s2 + $0x8] sm:$0xff]  ;;  %v35_v7 = vld [vmem:[%s521_s2 + $0x10] sm:$0xff]  ;;  %vm112_vm2 = vcmask 195584   ;;  %vm204_vm3 = vcmask 130048   ;;  %vm362_vm4 = vcmask 31744  }
   0x2   :  { %v36_v2 = vld [vmem:[%s520_s1] sm:$0xff]  ;;  %387 = vmatpush3.msra.mxu1 %v37_v1  ;;  %415 = vmatprep.subr.bf16.mxu0 %v423_v5  ;;  %v196_v10 = vld [vmem:[%s523_s5 + $0x8] sm:$0xff] }
   0x3   :  { %v33_v3 = vld [vmem:[%s521_s2] sm:$0xff]  ;;  %389 = vmatmul.mubr.msk.f32.vlgmr.msra.gmra.mrb[0].mxu1 %vm38_vm0, %v36_v2  ;;  %412 = vmatprep.subr.bf16.mxu1 %v423_v5 }
   0x4   :  { %v413_v6 = vpack.c.bf16 %v34_v4, %v33_v3  ;;  %397 = vmatprep.mubr.msk.f32.mxu1 %vm422_vm1, %v421_v0  ;;  %404 = vmatprep.mubr.msk.f32.mxu0 %vm422_vm1, %v421_v0  ;;  %v32_v8 = vld [vmem:[%s522_s0] sm:$0xff] }
   0x5   :  { %v195_v9 = vld [vmem:[%s523_s5] sm:$0xff] }
   0x6   :  { %414 = vmatpush3.bf16.msra.mxu1 %v413_v6  ;;  %v416_v11 = vpack.c.bf16 %v196_v10, %v195_v9  ;;  %v370_v15 = vld [vmem:[%s524_s4] ss:$0 sm:$0xff] }
   0x7   :  { %395 = vmatprep.subr.mxu1 %v421_v0  ;;  %v279_v20 = vld [vmem:[%s525_s7] sm:$0xff] }
   0x8   :  { %417 = vmatpush3.bf16.msra.mxu0 %v416_v11  ;;  %v371_v21 = vld [vmem:[%s526_s6] ss:$0 sm:$0xff] }
   0x9   :  { %407 = vmatprep.subr.mxu0 %v421_v0  ;;  %v373_v26 = vld [vmem:[%s527_s8] ss:$0 sm:$0xff] }
   0xa   :  { %396 = vmatpush3.msra.mxu1 %v35_v7 }
   0xb   :  { %398 = vmatmul.mubr.msk.f32.vlgmr.msra.gmra.mrb[2].mxu1 %vm112_vm2, %v32_v8 }
  0xd6   :  { %v108_v12 = vpop.f32.mrb[0].mxu1 }
  0xd7   :  { %v390_v13 = vpop.f32.mrb[1].mxu1 }
  0xde   :  { %v182_v14 = vpop.f32.mrb[2].mxu1 }
  0xdf   :  { %v183_v16 = vadd.f32 %v182_v14, %v108_v12  ;;  %v399_v17 = vpop.f32.mrb[3].mxu1 }
  0xe1   :  { %v193_v18 = vadd.f32 %v370_v15, %v183_v16 }
  0xe3   :  { %v194_v19 = vmax.f32 %v193_v18, 0.0 }
  0xe5   :  { %405 = vmatmul.mubr.msk.f32.vlgmr.msra.gmra.mrb[0].mxu0 %vm204_vm3, %v194_v19 }
  0xe6   :  { %409 = vmatprep.mubr.msk.f32.mxu0 %vm422_vm1, %v421_v0  ;;  %408 = vmatpush3.msra.mxu0 %v279_v20 }
 0x1b8   :  { %v274_v22 = vpop.f32.mrb[0].mxu0 }
 0x1b9   :  { %v275_v23 = vadd.f32 %v371_v21, %v274_v22  ;;  %v406_v24 = vpop.f32.mrb[1].mxu0 }
 0x1bb   :  { %v278_v25 = vmax.f32 %v275_v23, 0.0 }
 0x1bd   :  { %410 = vmatmul.mubr.msk.f32.vlgmr.msra.gmra.mrb[2].mxu0 %vm38_vm0, %v278_v25 }
 0x290   :  { %v356_v27 = vpop.f32.mrb[2].mxu0 }
 0x291   :  { %v357_v28 = vadd.f32 %v373_v26, %v356_v27  ;;  %v411_v29 = vpop.f32.mrb[3].mxu0 }
 0x293   :  { %v360_v30 = vmax.f32 %v357_v28, 0.0 }
 0x295   :  { %v361_v31 = vmin.f32 %v360_v30, 100.0 }
 0x297   :  { %363 = vst.msk [vmem:[%s528_s9] sm:$0xff] %vm362_vm4, %v361_v31 }

</bundles_post_ra>
